<compile_context>
chip_gen: v7x
topology: tpu7x:2x2x1
jax: 0.10.0
libtpu: 0.0.40
codegen_flags: <defaults>
</compile_context>

<pallas_src>
import math
import functools

import jax
import jax.numpy as jnp
from jax import lax
from jax.experimental import pallas as pl
from jax.experimental.pallas import tpu as pltpu

LN_EPS = 1e-5


def _layernorm(z, w_1e, b_1e):
    mu = jnp.mean(z, axis=-1, keepdims=True)
    var = jnp.mean((z - mu) ** 2, axis=-1, keepdims=True)
    return (z - mu) * lax.rsqrt(var + LN_EPS) * w_1e + b_1e


def _gelu_exact(x):
    # PyTorch nn.GELU() default (approximate='none'): 0.5*x*(1+erf(x/sqrt(2)))
    return 0.5 * x * (1.0 + lax.erf(x * (1.0 / math.sqrt(2.0))))


def gpt_block_kernel(
    x_ref,                 # (T, E)      f32   (one batch element per grid step)
    ln1w_ref, ln1b_ref,    # (1, E)      f32
    wqkv_ref, bqkv_ref,    # (E, 3E) bf16 (Q cols pre-scaled), (1, 3E) f32
    wo_ref, bo_ref,        # (H, D, E) bf16 (head-major), (1, E) f32
    ln2w_ref, ln2b_ref,    # (1, E)      f32
    wfc_ref, bfc_ref,      # (E, 4E) bf16, (1, 4E) f32
    wpr_ref, bpr_ref,      # (4E, E) bf16, (1, E)  f32
    y_ref,                 # (T, E)      f32
    *, n_heads,
):
    x = x_ref[...].astype(jnp.float32)                  # (T, E)
    T, E = x.shape
    H = n_heads
    D = E // H
    mm = wqkv_ref.dtype                                  # bf16 MXU inputs

    # Per-tile additive causal bias (grid step == one batch element, so a plain
    # lower-triangular mask is exact; no cross-batch terms, no // divide).
    row = lax.broadcasted_iota(jnp.int32, (T, T), 0)
    col = lax.broadcasted_iota(jnp.int32, (T, T), 1)
    bias = jnp.where(row >= col, 0.0, -1e30).astype(jnp.float32)   # (T, T)

    # ---------------- attention branch ----------------
    h = _layernorm(x, ln1w_ref[...], ln1b_ref[...])      # (T, E) f32
    qkv = jnp.dot(h.astype(mm), wqkv_ref[...],
                  preferred_element_type=jnp.float32) + bqkv_ref[...]   # (T, 3E)

    def split_heads(z):                                  # (T, E) -> (H, T, D) bf16
        return jnp.transpose(z.reshape(T, H, D), (1, 0, 2)).astype(mm)

    # 1/sqrt(D) is already folded into the Q slice of wqkv/bqkv (wrapper-side).
    q = split_heads(qkv[:, 0 * E:1 * E])
    k = split_heads(qkv[:, 1 * E:2 * E])
    v = split_heads(qkv[:, 2 * E:3 * E])

    s = jnp.einsum("hqd,hkd->hqk", q, k,
                   preferred_element_type=jnp.float32)                  # (H, T, T) f32
    s = s + bias[None]
    m = jnp.max(s, axis=-1, keepdims=True)
    p = jnp.exp(s - m)
    p = p * pl.reciprocal(jnp.sum(p, axis=-1, keepdims=True), approx=True)
    o = jnp.einsum("hqk,hkd->hqd", p.astype(mm), v,
                   preferred_element_type=jnp.float32)                  # (H, T, D) f32

    # Head merge folded into the out-projection: batched per-head MXU contraction
    # with the head-major (H, D, E) weight, then an H-way add (no transpose).
    ctx = jnp.einsum("hqd,hde->hqe", o.astype(mm), wo_ref[...],
                     preferred_element_type=jnp.float32)                # (H, T, E) f32
    attn_out = ctx[0]
    for hh in range(1, H):
        attn_out = attn_out + ctx[hh]
    attn_out = attn_out + bo_ref[...]
    x1 = x + attn_out

    # ---------------- MLP branch ----------------
    h2 = _layernorm(x1, ln2w_ref[...], ln2b_ref[...])
    f = jnp.dot(h2.astype(mm), wfc_ref[...],
                preferred_element_type=jnp.float32) + bfc_ref[...]
    g = _gelu_exact(f)        # f32 (keep generation-agnostic; bf16 ok on v6e/v7x)
    f2 = jnp.dot(g.astype(mm), wpr_ref[...],
                 preferred_element_type=jnp.float32) + bpr_ref[...]

    y_ref[...] = (x1 + f2).astype(y_ref.dtype)


def gpt_block(x, params, n_heads, matmul_dtype=jnp.bfloat16):
    B, T, E = x.shape
    assert E % n_heads == 0
    H = n_heads
    D = E // H
    (ln1w, ln1b, wqkv, bqkv, wo, bo, ln2w, ln2b, wfc, bfc, wpr, bpr) = params

    # Fold the 1/sqrt(D) attention scale into the Q slice of the QKV projection
    # (weight AND bias) — fuses with the bf16 cast, removes a full-size VPU
    # multiply of the score tensor from the kernel.
    qscale = jnp.concatenate(
        [jnp.full((1, E), 1.0 / math.sqrt(D), jnp.float32),
         jnp.ones((1, 2 * E), jnp.float32)], axis=1)
    wqkv_m = (wqkv * qscale).astype(matmul_dtype)
    bqkv_s = (bqkv * qscale).astype(jnp.float32)

    # Head-major out-projection weight so the kernel can contract per head
    # without a head-merge transpose.  Other matmul weights cast to bf16 once.
    # TODO(synk): at production sizes keep these bf16/head-major weights
    # persistent instead of converting per call (halves weight HBM traffic).
    wo_m = wo.reshape(H, D, E).astype(matmul_dtype)
    wfc_m = wfc.astype(matmul_dtype)
    wpr_m = wpr.astype(matmul_dtype)

    # Constant-index weight/bias specs: same resident block every grid step.
    rep = lambda shape: pl.BlockSpec(shape, lambda b: (0,) * len(shape))
    # One batch element per grid step (None squeezes the batch dim in-kernel).
    act_spec = pl.BlockSpec((None, T, E), lambda b: (b, 0, 0))

    in_specs = [
        act_spec,                                        # x
        rep((1, E)), rep((1, E)),                        # ln1 w, b
        rep((E, 3 * E)), rep((1, 3 * E)),                # qkv proj (Q pre-scaled)
        rep((H, D, E)), rep((1, E)),                     # out proj (head-major)
        rep((1, E)), rep((1, E)),                        # ln2 w, b
        rep((E, 4 * E)), rep((1, 4 * E)),                # ffn fc
        rep((4 * E, E)), rep((1, E)),                    # ffn proj
    ]

    y = pl.pallas_call(
        functools.partial(gpt_block_kernel, n_heads=n_heads),
        out_shape=jax.ShapeDtypeStruct((B, T, E), x.dtype),
        grid=(B,),
        in_specs=in_specs,
        out_specs=act_spec,
        compiler_params=pltpu.CompilerParams(
            dimension_semantics=("parallel",),           # both TCs busy on v7x
            vmem_limit_bytes=32 * 1024 * 1024),
    )(x, ln1w, ln1b, wqkv_m, bqkv_s, wo_m, bo, ln2w, ln2b, wfc_m, bfc, wpr_m, bpr)

    return y


# ------------------------- pure-JAX f32 reference -------------------------
def gpt_block_ref(x, params, n_heads):
    (ln1w, ln1b, wqkv, bqkv, wo, bo, ln2w, ln2b, wfc, bfc, wpr, bpr) = params
    B, T, E = x.shape
    D = E // n_heads

    def ln(z, w, b):
        mu = jnp.mean(z, axis=-1, keepdims=True)
        var = jnp.mean((z - mu) ** 2, axis=-1, keepdims=True)
        return (z - mu) / jnp.sqrt(var + LN_EPS) * w + b

    h = ln(x, ln1w, ln1b)
    qkv = h @ wqkv + bqkv
    q, k, v = jnp.split(qkv, 3, axis=-1)
    split = lambda z: z.reshape(B, T, n_heads, D).transpose(0, 2, 1, 3)
    q, k, v = split(q), split(k), split(v)
    s = jnp.einsum("bhtd,bhsd->bhts", q, k) / math.sqrt(D)
    mask = jnp.tril(jnp.ones((T, T), bool))
    s = jnp.where(mask, s, -1e30)
    p = jax.nn.softmax(s, axis=-1)
    o = jnp.einsum("bhts,bhsd->bhtd", p, v).transpose(0, 2, 1, 3).reshape(B, T, E)
    x1 = x + o @ wo + bo

    h2 = ln(x1, ln2w, ln2b)
    f = h2 @ wfc + bfc
    g = 0.5 * f * (1.0 + lax.erf(f / math.sqrt(2.0)))
    return x1 + g @ wpr + bpr


# ------------------------------- main --------------------------------
if __name__ == "__main__":
    B, T, E, n_heads = 2, 8, 32, 4
    key = jax.random.PRNGKey(0)
    ks = jax.random.split(key, 8)

    x = jax.random.normal(ks[0], (B, T, E), jnp.float32)

    ln1w = jnp.ones((1, E), jnp.float32)
    ln1b = jnp.zeros((1, E), jnp.float32)
    ln2w = jnp.ones((1, E), jnp.float32)
    ln2b = jnp.zeros((1, E), jnp.float32)

    wqkv = 0.02 * jax.random.normal(ks[1], (E, 3 * E), jnp.float32)
    bqkv = 0.01 * jax.random.normal(ks[2], (1, 3 * E), jnp.float32)
    wo = 0.02 * jax.random.normal(ks[3], (E, E), jnp.float32)
    bo = 0.01 * jax.random.normal(ks[4], (1, E), jnp.float32)
    wfc = 0.02 * jax.random.normal(ks[5], (E, 4 * E), jnp.float32)
    bfc = 0.01 * jax.random.normal(ks[6], (1, 4 * E), jnp.float32)
    wpr = 0.02 * jax.random.normal(ks[7], (4 * E, E), jnp.float32)
    bpr = jnp.zeros((1, E), jnp.float32)

    params = (ln1w, ln1b, wqkv, bqkv, wo, bo, ln2w, ln2b, wfc, bfc, wpr, bpr)

    y = gpt_block(x, params, n_heads)
    y = jax.block_until_ready(y)

    y_ref = gpt_block_ref(x, params, n_heads)
    # bf16 MXU inputs everywhere (f32 accumulation) + approx softmax reciprocal
    # -> slightly looser tolerance than a pure-f32 path (~1e-3 abs at these scales).
    assert jnp.allclose(y, y_ref, atol=5e-3, rtol=5e-3), \
        f"max err {jnp.max(jnp.abs(y - y_ref))}"

    print("KERNEL_OK")
</pallas_src>

<mosaic_0001>
module attributes {stable_mosaic.version = 11 : i64} {
  func.func @gpt_block_kernel(%arg0: i32, %arg1: memref<1x8x32xf32, #tpu.memory_space<vmem>>, %arg2: memref<1x32xf32, #tpu.memory_space<vmem>>, %arg3: memref<1x32xf32, #tpu.memory_space<vmem>>, %arg4: memref<32x96xbf16, #tpu.memory_space<vmem>>, %arg5: memref<1x96xf32, #tpu.memory_space<vmem>>, %arg6: memref<4x8x32xbf16, #tpu.memory_space<vmem>>, %arg7: memref<1x32xf32, #tpu.memory_space<vmem>>, %arg8: memref<1x32xf32, #tpu.memory_space<vmem>>, %arg9: memref<1x32xf32, #tpu.memory_space<vmem>>, %arg10: memref<32x128xbf16, #tpu.memory_space<vmem>>, %arg11: memref<1x128xf32, #tpu.memory_space<vmem>>, %arg12: memref<128x32xbf16, #tpu.memory_space<vmem>>, %arg13: memref<1x32xf32, #tpu.memory_space<vmem>>, %arg14: memref<1x8x32xf32, #tpu.memory_space<vmem>>) attributes {dimension_semantics = [#tpu.dimension_semantics<parallel>], iteration_bounds = array<i64: 2>, scalar_prefetch = 0 : i64, scratch_operands = 0 : i64, tpu.core_type = #tpu.core_type<tc>, window_params = [{transform_indices = @transform_0, window_bounds = array<i64: 1, 8, 32>}, {pipeline_mode = #tpu.pipeline_mode<synchronous>, transform_indices = @transform_1, window_bounds = array<i64: 1, 32>}, {pipeline_mode = #tpu.pipeline_mode<synchronous>, transform_indices = @transform_2, window_bounds = array<i64: 1, 32>}, {pipeline_mode = #tpu.pipeline_mode<synchronous>, transform_indices = @transform_3, window_bounds = array<i64: 32, 96>}, {pipeline_mode = #tpu.pipeline_mode<synchronous>, transform_indices = @transform_4, window_bounds = array<i64: 1, 96>}, {pipeline_mode = #tpu.pipeline_mode<synchronous>, transform_indices = @transform_5, window_bounds = array<i64: 4, 8, 32>}, {pipeline_mode = #tpu.pipeline_mode<synchronous>, transform_indices = @transform_6, window_bounds = array<i64: 1, 32>}, {pipeline_mode = #tpu.pipeline_mode<synchronous>, transform_indices = @transform_7, window_bounds = array<i64: 1, 32>}, {pipeline_mode = #tpu.pipeline_mode<synchronous>, transform_indices = @transform_8, window_bounds = array<i64: 1, 32>}, {pipeline_mode = #tpu.pipeline_mode<synchronous>, transform_indices = @transform_9, window_bounds = array<i64: 32, 128>}, {pipeline_mode = #tpu.pipeline_mode<synchronous>, transform_indices = @transform_10, window_bounds = array<i64: 1, 128>}, {pipeline_mode = #tpu.pipeline_mode<synchronous>, transform_indices = @transform_11, window_bounds = array<i64: 128, 32>}, {pipeline_mode = #tpu.pipeline_mode<synchronous>, transform_indices = @transform_12, window_bounds = array<i64: 1, 32>}, {transform_indices = @transform_13, window_bounds = array<i64: 1, 8, 32>}]} {
    %c0 = arith.constant 0 : index
    %c0_0 = arith.constant 0 : index
    %c0_1 = arith.constant 0 : index
    %0 = vector.load %arg1[%c0, %c0_0, %c0_1] : memref<1x8x32xf32, #tpu.memory_space<vmem>>, vector<1x8x32xf32>
    %1 = vector.shape_cast %0 : vector<1x8x32xf32> to vector<8x32xf32>
    %2 = tpu.iota {dimensions = array<i32: 0>} : vector<8x8xi32>
    %3 = tpu.iota {dimensions = array<i32: 1>} : vector<8x8xi32>
    %4 = arith.cmpi sge, %2, %3 : vector<8x8xi32>
    %cst = arith.constant 0.000000e+00 : f32
    %cst_2 = arith.constant -1.000000e+30 : f32
    %5 = vector.broadcast %cst : f32 to vector<8x8xf32>
    %6 = vector.broadcast %cst_2 : f32 to vector<8x8xf32>
    %7 = arith.select %4, %5, %6 : vector<8x8xi1>, vector<8x8xf32>
    %c0_3 = arith.constant 0 : index
    %c0_4 = arith.constant 0 : index
    %8 = vector.load %arg2[%c0_3, %c0_4] : memref<1x32xf32, #tpu.memory_space<vmem>>, vector<1x32xf32>
    %c0_5 = arith.constant 0 : index
    %c0_6 = arith.constant 0 : index
    %9 = vector.load %arg3[%c0_5, %c0_6] : memref<1x32xf32, #tpu.memory_space<vmem>>, vector<1x32xf32>
    %cst_7 = arith.constant dense<0.000000e+00> : vector<8xf32>
    %10 = vector.multi_reduction <add>, %1, %cst_7 [1] : vector<8x32xf32> to vector<8xf32>
    %11 = vector.shape_cast %10 : vector<8xf32> to vector<8x1xf32>
    %cst_8 = arith.constant 3.200000e+01 : f32
    %12 = vector.broadcast %cst_8 : f32 to vector<8x1xf32>
    %13 = arith.divf %11, %12 : vector<8x1xf32>
    %14 = vector.broadcast %13 : vector<8x1xf32> to vector<8x32xf32>
    %15 = arith.subf %1, %14 : vector<8x32xf32>
    %16 = arith.mulf %15, %15 : vector<8x32xf32>
    %cst_9 = arith.constant dense<0.000000e+00> : vector<8xf32>
    %17 = vector.multi_reduction <add>, %16, %cst_9 [1] : vector<8x32xf32> to vector<8xf32>
    %18 = vector.shape_cast %17 : vector<8xf32> to vector<8x1xf32>
    %cst_10 = arith.constant 3.200000e+01 : f32
    %19 = vector.broadcast %cst_10 : f32 to vector<8x1xf32>
    %20 = arith.divf %18, %19 : vector<8x1xf32>
    %21 = vector.broadcast %13 : vector<8x1xf32> to vector<8x32xf32>
    %22 = arith.subf %1, %21 : vector<8x32xf32>
    %cst_11 = arith.constant 9.99999974E-6 : f32
    %23 = vector.broadcast %cst_11 : f32 to vector<8x1xf32>
    %24 = arith.addf %20, %23 : vector<8x1xf32>
    %25 = math.rsqrt %24 : vector<8x1xf32>
    %26 = vector.broadcast %25 : vector<8x1xf32> to vector<8x32xf32>
    %27 = arith.mulf %22, %26 : vector<8x32xf32>
    %28 = vector.broadcast %8 : vector<1x32xf32> to vector<8x32xf32>
    %29 = arith.mulf %27, %28 : vector<8x32xf32>
    %30 = vector.broadcast %9 : vector<1x32xf32> to vector<8x32xf32>
    %31 = arith.addf %29, %30 : vector<8x32xf32>
    %32 = arith.truncf %31 : vector<8x32xf32> to vector<8x32xbf16>
    %c0_12 = arith.constant 0 : index
    %c0_13 = arith.constant 0 : index
    %33 = vector.load %arg4[%c0_12, %c0_13] : memref<32x96xbf16, #tpu.memory_space<vmem>>, vector<32x96xbf16>
    %cst_14 = arith.constant dense<0.000000e+00> : vector<8x96xf32>
    %34 = tpu.matmul %32, %33, %cst_14 {dimension_numbers = #tpu.dot_dimension_numbers<[1], [0], [0], [1], [0, 0, 1, 1], [], []>} : vector<8x32xbf16>, vector<32x96xbf16>, vector<8x96xf32> -> vector<8x96xf32>
    %c0_15 = arith.constant 0 : index
    %c0_16 = arith.constant 0 : index
    %35 = vector.load %arg5[%c0_15, %c0_16] : memref<1x96xf32, #tpu.memory_space<vmem>>, vector<1x96xf32>
    %36 = vector.broadcast %35 : vector<1x96xf32> to vector<8x96xf32>
    %37 = arith.addf %34, %36 : vector<8x96xf32>
    %38 = vector.extract_strided_slice %37 {offsets = [0, 0], sizes = [8, 32], strides = [1, 1]} : vector<8x96xf32> to vector<8x32xf32>
    %39 = vector.shape_cast %38 : vector<8x32xf32> to vector<8x4x8xf32>
    %40 = tpu.transpose %39, [1, 0, 2] : vector<8x4x8xf32> -> vector<4x8x8xf32>
    %41 = arith.truncf %40 : vector<4x8x8xf32> to vector<4x8x8xbf16>
    %42 = vector.extract_strided_slice %37 {offsets = [0, 32], sizes = [8, 32], strides = [1, 1]} : vector<8x96xf32> to vector<8x32xf32>
    %43 = vector.shape_cast %42 : vector<8x32xf32> to vector<8x4x8xf32>
    %44 = tpu.transpose %43, [1, 0, 2] : vector<8x4x8xf32> -> vector<4x8x8xf32>
    %45 = arith.truncf %44 : vector<4x8x8xf32> to vector<4x8x8xbf16>
    %46 = vector.extract_strided_slice %37 {offsets = [0, 64], sizes = [8, 32], strides = [1, 1]} : vector<8x96xf32> to vector<8x32xf32>
    %47 = vector.shape_cast %46 : vector<8x32xf32> to vector<8x4x8xf32>
    %48 = tpu.transpose %47, [1, 0, 2] : vector<8x4x8xf32> -> vector<4x8x8xf32>
    %49 = arith.truncf %48 : vector<4x8x8xf32> to vector<4x8x8xbf16>
    "tpu.trace_start"() <{level = 10 : i32, message = "hqd,hkd->hqk"}> : () -> ()
    %cst_17 = arith.constant dense<0.000000e+00> : vector<4x8x8xf32>
    %50 = tpu.matmul %41, %45, %cst_17 {dimension_numbers = #tpu.dot_dimension_numbers<[2], [2], [1], [1], [0, 0, 0, 1, 1, 1], [0], [0]>} : vector<4x8x8xbf16>, vector<4x8x8xbf16>, vector<4x8x8xf32> -> vector<4x8x8xf32>
    "tpu.trace_stop"() : () -> ()
    %51 = vector.shape_cast %7 : vector<8x8xf32> to vector<1x8x8xf32>
    %52 = vector.broadcast %51 : vector<1x8x8xf32> to vector<4x8x8xf32>
    %53 = arith.addf %50, %52 : vector<4x8x8xf32>
    %cst_18 = arith.constant dense<0xFF800000> : vector<4x8xf32>
    %54 = vector.multi_reduction <maximumf>, %53, %cst_18 [2] : vector<4x8x8xf32> to vector<4x8xf32>
    %55 = vector.shape_cast %54 : vector<4x8xf32> to vector<4x8x1xf32>
    %56 = vector.broadcast %55 : vector<4x8x1xf32> to vector<4x8x8xf32>
    %57 = arith.subf %53, %56 : vector<4x8x8xf32>
    %58 = math.exp %57 : vector<4x8x8xf32>
    %cst_19 = arith.constant dense<0.000000e+00> : vector<4x8xf32>
    %59 = vector.multi_reduction <add>, %58, %cst_19 [2] : vector<4x8x8xf32> to vector<4x8xf32>
    %60 = vector.shape_cast %59 : vector<4x8xf32> to vector<4x8x1xf32>
    %61 = tpu.reciprocal %60 {approx = true} : vector<4x8x1xf32> -> vector<4x8x1xf32>
    %62 = vector.broadcast %61 : vector<4x8x1xf32> to vector<4x8x8xf32>
    %63 = arith.mulf %58, %62 : vector<4x8x8xf32>
    %64 = arith.truncf %63 : vector<4x8x8xf32> to vector<4x8x8xbf16>
    "tpu.trace_start"() <{level = 10 : i32, message = "hqk,hkd->hqd"}> : () -> ()
    %cst_20 = arith.constant dense<0.000000e+00> : vector<4x8x8xf32>
    %65 = tpu.matmul %64, %49, %cst_20 {dimension_numbers = #tpu.dot_dimension_numbers<[2], [1], [1], [2], [0, 0, 0, 1, 1, 2], [0], [0]>} : vector<4x8x8xbf16>, vector<4x8x8xbf16>, vector<4x8x8xf32> -> vector<4x8x8xf32>
    "tpu.trace_stop"() : () -> ()
    %66 = arith.truncf %65 : vector<4x8x8xf32> to vector<4x8x8xbf16>
    %c0_21 = arith.constant 0 : index
    %c0_22 = arith.constant 0 : index
    %c0_23 = arith.constant 0 : index
    %67 = vector.load %arg6[%c0_21, %c0_22, %c0_23] : memref<4x8x32xbf16, #tpu.memory_space<vmem>>, vector<4x8x32xbf16>
    "tpu.trace_start"() <{level = 10 : i32, message = "hqd,hde->hqe"}> : () -> ()
    %cst_24 = arith.constant dense<0.000000e+00> : vector<4x8x32xf32>
    %68 = tpu.matmul %66, %67, %cst_24 {dimension_numbers = #tpu.dot_dimension_numbers<[2], [1], [1], [2], [0, 0, 0, 1, 1, 2], [0], [0]>} : vector<4x8x8xbf16>, vector<4x8x32xbf16>, vector<4x8x32xf32> -> vector<4x8x32xf32>
    "tpu.trace_stop"() : () -> ()
    %69 = vector.extract_strided_slice %68 {offsets = [0, 0, 0], sizes = [1, 8, 32], strides = [1, 1, 1]} : vector<4x8x32xf32> to vector<1x8x32xf32>
    %70 = vector.shape_cast %69 : vector<1x8x32xf32> to vector<8x32xf32>
    %71 = vector.extract_strided_slice %68 {offsets = [1, 0, 0], sizes = [1, 8, 32], strides = [1, 1, 1]} : vector<4x8x32xf32> to vector<1x8x32xf32>
    %72 = vector.shape_cast %71 : vector<1x8x32xf32> to vector<8x32xf32>
    %73 = arith.addf %70, %72 : vector<8x32xf32>
    %74 = vector.extract_strided_slice %68 {offsets = [2, 0, 0], sizes = [1, 8, 32], strides = [1, 1, 1]} : vector<4x8x32xf32> to vector<1x8x32xf32>
    %75 = vector.shape_cast %74 : vector<1x8x32xf32> to vector<8x32xf32>
    %76 = arith.addf %73, %75 : vector<8x32xf32>
    %77 = vector.extract_strided_slice %68 {offsets = [3, 0, 0], sizes = [1, 8, 32], strides = [1, 1, 1]} : vector<4x8x32xf32> to vector<1x8x32xf32>
    %78 = vector.shape_cast %77 : vector<1x8x32xf32> to vector<8x32xf32>
    %79 = arith.addf %76, %78 : vector<8x32xf32>
    %c0_25 = arith.constant 0 : index
    %c0_26 = arith.constant 0 : index
    %80 = vector.load %arg7[%c0_25, %c0_26] : memref<1x32xf32, #tpu.memory_space<vmem>>, vector<1x32xf32>
    %81 = vector.broadcast %80 : vector<1x32xf32> to vector<8x32xf32>
    %82 = arith.addf %79, %81 : vector<8x32xf32>
    %83 = arith.addf %1, %82 : vector<8x32xf32>
    %c0_27 = arith.constant 0 : index
    %c0_28 = arith.constant 0 : index
    %84 = vector.load %arg8[%c0_27, %c0_28] : memref<1x32xf32, #tpu.memory_space<vmem>>, vector<1x32xf32>
    %c0_29 = arith.constant 0 : index
    %c0_30 = arith.constant 0 : index
    %85 = vector.load %arg9[%c0_29, %c0_30] : memref<1x32xf32, #tpu.memory_space<vmem>>, vector<1x32xf32>
    %cst_31 = arith.constant dense<0.000000e+00> : vector<8xf32>
    %86 = vector.multi_reduction <add>, %83, %cst_31 [1] : vector<8x32xf32> to vector<8xf32>
    %87 = vector.shape_cast %86 : vector<8xf32> to vector<8x1xf32>
    %cst_32 = arith.constant 3.200000e+01 : f32
    %88 = vector.broadcast %cst_32 : f32 to vector<8x1xf32>
    %89 = arith.divf %87, %88 : vector<8x1xf32>
    %90 = vector.broadcast %89 : vector<8x1xf32> to vector<8x32xf32>
    %91 = arith.subf %83, %90 : vector<8x32xf32>
    %92 = arith.mulf %91, %91 : vector<8x32xf32>
    %cst_33 = arith.constant dense<0.000000e+00> : vector<8xf32>
    %93 = vector.multi_reduction <add>, %92, %cst_33 [1] : vector<8x32xf32> to vector<8xf32>
    %94 = vector.shape_cast %93 : vector<8xf32> to vector<8x1xf32>
    %cst_34 = arith.constant 3.200000e+01 : f32
    %95 = vector.broadcast %cst_34 : f32 to vector<8x1xf32>
    %96 = arith.divf %94, %95 : vector<8x1xf32>
    %97 = vector.broadcast %89 : vector<8x1xf32> to vector<8x32xf32>
    %98 = arith.subf %83, %97 : vector<8x32xf32>
    %cst_35 = arith.constant 9.99999974E-6 : f32
    %99 = vector.broadcast %cst_35 : f32 to vector<8x1xf32>
    %100 = arith.addf %96, %99 : vector<8x1xf32>
    %101 = math.rsqrt %100 : vector<8x1xf32>
    %102 = vector.broadcast %101 : vector<8x1xf32> to vector<8x32xf32>
    %103 = arith.mulf %98, %102 : vector<8x32xf32>
    %104 = vector.broadcast %84 : vector<1x32xf32> to vector<8x32xf32>
    %105 = arith.mulf %103, %104 : vector<8x32xf32>
    %106 = vector.broadcast %85 : vector<1x32xf32> to vector<8x32xf32>
    %107 = arith.addf %105, %106 : vector<8x32xf32>
    %108 = arith.truncf %107 : vector<8x32xf32> to vector<8x32xbf16>
    %c0_36 = arith.constant 0 : index
    %c0_37 = arith.constant 0 : index
    %109 = vector.load %arg10[%c0_36, %c0_37] : memref<32x128xbf16, #tpu.memory_space<vmem>>, vector<32x128xbf16>
    %cst_38 = arith.constant dense<0.000000e+00> : vector<8x128xf32>
    %110 = tpu.matmul %108, %109, %cst_38 {dimension_numbers = #tpu.dot_dimension_numbers<[1], [0], [0], [1], [0, 0, 1, 1], [], []>} : vector<8x32xbf16>, vector<32x128xbf16>, vector<8x128xf32> -> vector<8x128xf32>
    %c0_39 = arith.constant 0 : index
    %c0_40 = arith.constant 0 : index
    %111 = vector.load %arg11[%c0_39, %c0_40] : memref<1x128xf32, #tpu.memory_space<vmem>>, vector<1x128xf32>
    %112 = vector.broadcast %111 : vector<1x128xf32> to vector<8x128xf32>
    %113 = arith.addf %110, %112 : vector<8x128xf32>
    %cst_41 = arith.constant 5.000000e-01 : f32
    %114 = vector.broadcast %cst_41 : f32 to vector<8x128xf32>
    %115 = arith.mulf %114, %113 : vector<8x128xf32>
    %cst_42 = arith.constant 0.707106769 : f32
    %116 = vector.broadcast %cst_42 : f32 to vector<8x128xf32>
    %117 = arith.mulf %113, %116 : vector<8x128xf32>
    %118 = math.erf %117 : vector<8x128xf32>
    %cst_43 = arith.constant 1.000000e+00 : f32
    %119 = vector.broadcast %cst_43 : f32 to vector<8x128xf32>
    %120 = arith.addf %119, %118 : vector<8x128xf32>
    %121 = arith.mulf %115, %120 : vector<8x128xf32>
    %122 = arith.truncf %121 : vector<8x128xf32> to vector<8x128xbf16>
    %c0_44 = arith.constant 0 : index
    %c0_45 = arith.constant 0 : index
    %123 = vector.load %arg12[%c0_44, %c0_45] : memref<128x32xbf16, #tpu.memory_space<vmem>>, vector<128x32xbf16>
    %cst_46 = arith.constant dense<0.000000e+00> : vector<8x32xf32>
    %124 = tpu.matmul %122, %123, %cst_46 {dimension_numbers = #tpu.dot_dimension_numbers<[1], [0], [0], [1], [0, 0, 1, 1], [], []>} : vector<8x128xbf16>, vector<128x32xbf16>, vector<8x32xf32> -> vector<8x32xf32>
    %c0_47 = arith.constant 0 : index
    %c0_48 = arith.constant 0 : index
    %125 = vector.load %arg13[%c0_47, %c0_48] : memref<1x32xf32, #tpu.memory_space<vmem>>, vector<1x32xf32>
    %126 = vector.broadcast %125 : vector<1x32xf32> to vector<8x32xf32>
    %127 = arith.addf %124, %126 : vector<8x32xf32>
    %128 = arith.addf %83, %127 : vector<8x32xf32>
    %c0_49 = arith.constant 0 : index
    %c0_50 = arith.constant 0 : index
    %c0_51 = arith.constant 0 : index
    %129 = vector.load %arg14[%c0_49, %c0_50, %c0_51] : memref<1x8x32xf32, #tpu.memory_space<vmem>>, vector<1x8x32xf32>
    %130 = vector.shape_cast %129 : vector<1x8x32xf32> to vector<8x32xf32>
    %131 = vector.shape_cast %128 : vector<8x32xf32> to vector<1x8x32xf32>
    tpu.vector_store %arg14[%c0_49, %c0_50, %c0_51], %131 {strides = array<i32>} : memref<1x8x32xf32, #tpu.memory_space<vmem>>, vector<1x8x32xf32>,
    return
  }
  func.func @transform_0(%arg0: i32) -> (i32, i32, i32) {
    %c0_i32 = arith.constant 0 : i32
    %c0_i32_0 = arith.constant 0 : i32
    %c0_i32_1 = arith.constant 0 : i32
    return %arg0, %c0_i32, %c0_i32_0 : i32, i32, i32
  }
  func.func @transform_1(%arg0: i32) -> (i32, i32) {
    %c0_i32 = arith.constant 0 : i32
    %c0_i32_0 = arith.constant 0 : i32
    %c0_i32_1 = arith.constant 0 : i32
    return %c0_i32, %c0_i32_0 : i32, i32
  }
  func.func @transform_2(%arg0: i32) -> (i32, i32) {
    %c0_i32 = arith.constant 0 : i32
    %c0_i32_0 = arith.constant 0 : i32
    %c0_i32_1 = arith.constant 0 : i32
    return %c0_i32, %c0_i32_0 : i32, i32
  }
  func.func @transform_3(%arg0: i32) -> (i32, i32) {
    %c0_i32 = arith.constant 0 : i32
    %c0_i32_0 = arith.constant 0 : i32
    %c0_i32_1 = arith.constant 0 : i32
    return %c0_i32, %c0_i32_0 : i32, i32
  }
  func.func @transform_4(%arg0: i32) -> (i32, i32) {
    %c0_i32 = arith.constant 0 : i32
    %c0_i32_0 = arith.constant 0 : i32
    %c0_i32_1 = arith.constant 0 : i32
    return %c0_i32, %c0_i32_0 : i32, i32
  }
  func.func @transform_5(%arg0: i32) -> (i32, i32, i32) {
    %c0_i32 = arith.constant 0 : i32
    %c0_i32_0 = arith.constant 0 : i32
    %c0_i32_1 = arith.constant 0 : i32
    %c0_i32_2 = arith.constant 0 : i32
    return %c0_i32, %c0_i32_0, %c0_i32_1 : i32, i32, i32
  }
  func.func @transform_6(%arg0: i32) -> (i32, i32) {
    %c0_i32 = arith.constant 0 : i32
    %c0_i32_0 = arith.constant 0 : i32
    %c0_i32_1 = arith.constant 0 : i32
    return %c0_i32, %c0_i32_0 : i32, i32
  }
  func.func @transform_7(%arg0: i32) -> (i32, i32) {
    %c0_i32 = arith.constant 0 : i32
    %c0_i32_0 = arith.constant 0 : i32
    %c0_i32_1 = arith.constant 0 : i32
    return %c0_i32, %c0_i32_0 : i32, i32
  }
  func.func @transform_8(%arg0: i32) -> (i32, i32) {
    %c0_i32 = arith.constant 0 : i32
    %c0_i32_0 = arith.constant 0 : i32
    %c0_i32_1 = arith.constant 0 : i32
    return %c0_i32, %c0_i32_0 : i32, i32
  }
  func.func @transform_9(%arg0: i32) -> (i32, i32) {
    %c0_i32 = arith.constant 0 : i32
    %c0_i32_0 = arith.constant 0 : i32
    %c0_i32_1 = arith.constant 0 : i32
    return %c0_i32, %c0_i32_0 : i32, i32
  }
  func.func @transform_10(%arg0: i32) -> (i32, i32) {
    %c0_i32 = arith.constant 0 : i32
    %c0_i32_0 = arith.constant 0 : i32
    %c0_i32_1 = arith.constant 0 : i32
    return %c0_i32, %c0_i32_0 : i32, i32
  }
  func.func @transform_11(%arg0: i32) -> (i32, i32) {
    %c0_i32 = arith.constant 0 : i32
    %c0_i32_0 = arith.constant 0 : i32
    %c0_i32_1 = arith.constant 0 : i32
    return %c0_i32, %c0_i32_0 : i32, i32
  }
  func.func @transform_12(%arg0: i32) -> (i32, i32) {
    %c0_i32 = arith.constant 0 : i32
    %c0_i32_0 = arith.constant 0 : i32
    %c0_i32_1 = arith.constant 0 : i32
    return %c0_i32, %c0_i32_0 : i32, i32
  }
  func.func @transform_13(%arg0: i32) -> (i32, i32, i32) {
    %c0_i32 = arith.constant 0 : i32
    %c0_i32_0 = arith.constant 0 : i32
    %c0_i32_1 = arith.constant 0 : i32
    return %arg0, %c0_i32, %c0_i32_0 : i32, i32, i32
  }
}

</mosaic_0001>

<bundles_post_ra>
// kernel: tpu_custom_call.1
= control target key start
LH: loop header
LB: loop body
LE: loop exit
PB: predicated region body
PF: predicated region fallthrough
CT: control target
= control target key end

     0   :  { %s2708_s0 = inlined_call_operand.vmem [shape: f32[2,8,32], index: 0, kind: input, shape index: {}]   ;;  %s2709_s1 = inlined_call_operand.vmem [shape: f32[1,32], index: 1, kind: input, shape index: {}]   ;;  %s2710_s2 = inlined_call_operand.vmem [shape: f32[1,32], index: 2, kind: input, shape index: {}]   ;;  %s2711_s3 = inlined_call_operand.vmem [shape: bf16[32,96], index: 3, kind: input, shape index: {}]   ;;  %s2712_s4 = inlined_call_operand.vmem [shape: f32[1,96], index: 4, kind: input, shape index: {}]   ;;  %s2713_s5 = inlined_call_operand.vmem [shape: bf16[4,8,32], index: 5, kind: input, shape index: {}]   ;;  %s2714_s6 = inlined_call_operand.vmem [shape: f32[1,32], index: 6, kind: input, shape index: {}]   ;;  %s2715_s7 = inlined_call_operand.vmem [shape: f32[1,32], index: 7, kind: input, shape index: {}]   ;;  %s2716_s8 = inlined_call_operand.vmem [shape: f32[1,32], index: 8, kind: input, shape index: {}]   ;;  %s2717_s9 = inlined_call_operand.vmem [shape: bf16[32,128], index: 9, kind: input, shape index: {}]   ;;  %s2718_s10 = inlined_call_operand.vmem [shape: f32[1,128], index: 10, kind: input, shape index: {}]   ;;  %s2719_s11 = inlined_call_operand.vmem [shape: bf16[128,32], index: 11, kind: input, shape index: {}]   ;;  %s2720_s12 = inlined_call_operand.vmem [shape: f32[1,32], index: 12, kind: input, shape index: {}]   ;;  %s2721_s13 = inlined_call_operand.hbm [shape: f32[2,8,32], index: 13, kind: output, shape index: {}]  }
   0x1   :  { %2722 = sst [smem:[#allocation5_spill]] %s2708_s0 }
   0x2   :  { %2723 = sst [smem:[#allocation6_spill]] %s2709_s1 }
   0x3   :  { %2724 = sst [smem:[#allocation7_spill]] %s2710_s2 }
   0x4   :  { %18 = vsyncpa [#allocation3], 0 }
   0x5   :  { %20 = vsyncpa [#allocation3 + $0x1], 0  ;;  %s2331_s25 = smov 0   ;;  %s2333_s26 = smov 0  }
   0x6   :  { %s2335_s27 = smov 0   ;;  %s2337_s28 = smov 0  }
   0x7 LB: > { %s2352_s29 = sadd.s32 4294967295, %s2248_s28   ;;  %s1906_s30 = sadd.s32 4294967294, %s2248_s28   ;;  %s2248_s28 = sphi %s2337_s28, %s2733_s28   ;;  %s2244_s27 = sphi %s2335_s27, %s2732_s27   ;;  %s2240_s26 = sphi %s2333_s26, %s2731_s26   ;;  %s2236_s25 = sphi %s2331_s25, %s2730_s25  }
   0x8   : > { %s2356_s14 = sadd.s32 1, %s2248_s28   ;;  %s311_s15 = sadd.s32 1, %s2244_s27 }
   0x9   : > { %s308_s16 = ssub.s32 %s2248_s28, %s2356_s14  ;;  %p321_p0 = scmp.ne.s32.totalorder %s2244_s27, %s2240_s26 }
   0xa   : > { %p309_p1 = scmp.eq.s32.totalorder %s308_s16, 0  ;;  %p322_p2 = scmp.eq.s32.totalorder %s2352_s29, 1 }
   0xb   : > { %p327_p3 = scmp.ne.s32.totalorder %s2240_s26, %s2236_s25  ;;  %p328_p4 = scmp.eq.s32.totalorder %s1906_s30, 1 }
   0xc   : > { %s2367_s17 = scalar_select %p309_p1, %s2244_s27, %s311_s15  }
   0xd   : > { %p2369_p5 = por %p322_p2, %p321_p0  ;;  %p2373_p6 = por %p328_p4, %p327_p3 }
   0xe   : > { %p1909_p7 = scmp.ge.s32.totalorder %s2248_s28, 1  ;;  %p389_p8 = scmp.lt.s32.totalorder %s2248_s28, 3 }
  0x10   : > { %p390_p9 = pnand %p1909_p7, %p389_p8 }
  0x11   : > { %p432_p10 = scmp.lt.s32.totalorder (!%p390_p9), %s2352_s29, 1  ;;  %vm446_vm0 = vcmask (!%p390_p9), 261120   ;;  %s2727_s0 = sld [smem:[#allocation5_spill]] (!%p390_p9)  ;;  %v2152_v7 = vld [vmem:[%s2711_s3] sm:$0xff] (!%p390_p9)   ;;  %v2250_v8 = vmov (!%p390_p9), 0.0   ;;  %vm2251_vm1 = vmmov (!%p390_p9), 0   ;;  %v438_v29 = vlaneseq (!%p390_p9) }
  0x12   : > { %393 = sbr.rel (%p390_p9) target bundleno = 2628 (0xa44), region = 72  ;;  %1995 = vmatprep.subr.bf16.mxu1 (!%p390_p9), %v2250_v8  ;;  %1999 = vmatprep.mubr.msk.bf16.mxu1 (!%p390_p9), %vm2251_vm1, %v2250_v8  ;;  %v2153_v9 = vld [vmem:[%s2711_s3 + $0x8] sm:$0xff] (!%p390_p9)   ;;  %s2728_s1 = sld [smem:[#allocation6_spill]] (!%p390_p9)  ;;  %v1914_v20 = vld [vmem:[%s2712_s4] ss:$0 sm:$0xff] (!%p390_p9)  ;;  %vm996_vm2 = vcmask (!%p390_p9), 64512  }
  0x13   : > { %1996 = vmatpush3.bf16.msra.mxu1 (!%p390_p9), %v2152_v7  ;;  %2021 = vmatprep.subr.bf16.mxu0 (!%p390_p9), %v2250_v8  ;;  %s2729_s2 = sld [smem:[#allocation7_spill]] (!%p390_p9)  ;;  %s2252_s16 = smov (!%p390_p9), 104   ;;  %v2256_v30 = vmov (!%p390_p9), 1983009808   ;;  %v2432_v32 = vshrl.u32 (!%p390_p9), %v438_v29, 7  ;;  %vm1232_vm4 = vcmask (!%p390_p9), 1043456  }
  0x14   : > { %1997 = vmatprep.subr.bf16.mxu1 (!%p390_p9), %v2250_v8  ;;  %2023 = vmatprep.mubr.msk.bf16.mxu0 (!%p390_p9), %vm2251_vm1, %v2250_v8  ;;  %s2255_s22 = smov (!%p390_p9), 96   ;;  %v555_v31 = vunpack.c.l.s4 (!%p390_p9), %v2256_v30  ;;  %v2257_v35 = vmov (!%p390_p9), 1934713408   ;;  %s2259_s23 = smov (!%p390_p9), 64  }
  0x15   : > { %v587_v36 = vunpack.c.l.s4 (!%p390_p9), %v2257_v35 }
  0x16   : > { %v556_v33 = vunpack.c.0.s8 (!%p390_p9), %v555_v31 }
  0x17   : > { %1998 = vmatpush3.bf16.msra.mxu1 (!%p390_p9), %v2153_v9  ;;  %v588_v43 = vunpack.c.0.s8 (!%p390_p9), %v587_v36 }
  0x18   : > { %2003 = vmatprep.subr.bf16.mxu1 (!%p390_p9), %v2250_v8  ;;  %v1912_v14 = vld [vmem:[%s2728_s1] ss:$0 sm:$0xff] (!%p390_p9)  ;;  %v2439_v39 = vsub.s32 (!%p390_p9), %v556_v33, %v2432_v32 }
  0x19   : > { %s433_s20 = scalar_select %p432_p10, %s2352_s29, 1  ;;  %v1913_v16 = vld [vmem:[%s2729_s2] ss:$0 sm:$0xff]  ;;  %v2450_v49 = vsub.s32 %v588_v43, %v2432_v32 }
  0x1b   : > { %s1911_s21 = sshll.u32 %s433_s20, 3  ;;  %s2253_s20 = smov 120  }
  0x1c   : > { %s435_s24 = scalar_lea.vmem %s2727_s0, %s1911_s21  ;;  %s2254_s21 = smov 112  }
  0x1d   : > { %v2384_v0 = vld [vmem:[%s435_s24] sm:$0xff]  ;;  %s1953_s24 = sshll.u32 %s2352_s29, 7 }
  0x1e   : > { %v447_v1 = vsel %vm446_vm0, %v2384_v0, 0.0  ;;  %s2665_s1 = scalar_lea.hbm %s2721_s13, %s1953_s24 }
  0x1f   : > { %448 = vadd.xlane.f32.xlu0 %v447_v1 }
  0xac   : > { %v449_v2 = vpop.xlane.xlu0 %448 }
  0xad   : > { %v451_v3 = vmul.f32 0.03125, %v449_v2 }
  0xaf   : > { %v452_v4 = vsub.f32 %v2384_v0, %v451_v3 }
  0xb1   : > { %v453_v5 = vmul.f32 %v452_v4, %v452_v4 }
  0xb3   : > { %v454_v6 = vsel %vm446_vm0, %v453_v5, 0.0 }
  0xb4   : > { %455 = vadd.xlane.f32.xlu0 %v454_v6 }
 0x141   : > { %v456_v10 = vpop.xlane.xlu0 %455 }
 0x142   : > { %v457_v11 = vmul.f32 0.03125, %v456_v10 }
 0x144   : > { %v458_v12 = vadd.f32 1e-05, %v457_v11 }
 0x146   : > { %2164 = vrsqrt.f32 %v458_v12 }
 0x150   : > { %v2165_v13 = vpop.eup %2164 }
 0x151   : > { %v460_v15 = vmul.f32 %v2165_v13, %v452_v4 }
 0x153   : > { %v467_v17 = vmul.f32 %v1912_v14, %v460_v15 }
 0x155   : > { %v474_v18 = vadd.f32 %v1913_v16, %v467_v17 }
 0x157   : > { %v475_v19 = vpack.c.bf16 %v474_v18, %v474_v18 }
 0x159   : > { %2000 = vmatmul.mubr.msk.bf16.vlgmr.msra.gmra.mrb[0].mxu1 %vm446_vm0, %v475_v19 }
 0x15a   : > { %2005 = vmatprep.mubr.msk.bf16.mxu1 %vm2251_vm1, %v2250_v8 }
 0x22c   : > { %v536_v21 = vpop.f32.mrb[0].mxu1 }
 0x22d   : > { %v2416_v22 = vadd.f32 %v1914_v20, %v536_v21  ;;  %v2001_v23 = vpop.f32.mrb[1].mxu1 }
 0x22e   : > { %v539_v24 = vpop.f32.mrb[2].mxu1 }
 0x22f   : > { %549 = vrot.lane.b32.xlu0 %v2416_v22, %s2252_s16  ;;  %543 = vrot.lane.b32.xlu1 %v2416_v22, %s2253_s20  ;;  %v2002_v25 = vpop.f32.mrb[3].mxu1  ;;  %s429_s20 = sand.u32 1, %s2240_s26  }
 0x230   : > { %s1834_s29 = scalar_lea.sflag [#allocation3], %s429_s20 }
 0x233   : > { %546 = vrot.lane.b32.xlu1 %v2416_v22, %s2254_s21  ;;  %s1910_s21 = sshll.u32 %s429_s20, 3 }
 0x234   : > { %s431_s30 = scalar_lea.vmem [#allocation2], %s1910_s21 }
 0x235   : > { %s1847_s15 = sshll.u32 %s431_s30, 4  ;;  %s2667_s15 = int_to_ptr.vmem [resolvable:$true] %s1847_s15 }
 0x236   : > { %s2186_s21 = scalar_lea.vmem %s2667_s15, 128 }
 0x237   : > { %692 = vrot.lane.b32.xlu1 %v2416_v22, %s2255_s22  ;;  %p2187_p11 = scmp.ne.s32.totalorder %s2667_s15, %s2186_s21 }
 0x239   : > { %p2188_p12 = pnand %p2187_p11, %p2369_p5 }
 0x23b   : > { %p2189_p13 = pneg %p2188_p12 }
 0x2a1   : > { %v2422_v26 = vpop.permute.xlu1 %543  ;;  %v2428_v28 = vpop.permute.xlu0 %549 }
 0x2a2   : > { %694 = vrot.lane.b32.xlu1 %v2422_v26, %s2255_s22  ;;  %v568_v40 = vcombine.low %v2422_v26, %v2428_v28  ;;  %v569_v41 = vcombine.high %v2422_v26, %v2428_v28 }
 0x2a4   : > { %v576_v46 = vrot.slane %v568_v40, %v2439_v39  ;;  %v583_v47 = vrot.slane %v569_v41, %v2439_v39 }
 0x2a5   : > { %v2425_v27 = vpop.permute.xlu1 %546 }
 0x2a6   : > { %696 = vrot.lane.b32.xlu1 %v2425_v27, %s2255_s22  ;;  %v552_v37 = vcombine.low %v2416_v22, %v2425_v27  ;;  %v553_v38 = vcombine.high %v2416_v22, %v2425_v27 }
 0x2a8   : > { %v560_v44 = vrot.slane %v552_v37, %v2439_v39  ;;  %v567_v45 = vrot.slane %v553_v38, %v2439_v39 }
 0x2a9   : > { %v693_v34 = vpop.permute.xlu1 %692 }
 0x2aa   : > { %698 = vrot.lane.b32.xlu1 %v2428_v28, %s2255_s22  ;;  %v584_v50 = vcombine.low %v560_v44, %v576_v46  ;;  %v585_v51 = vcombine.high %v560_v44, %v576_v46  ;;  %v600_v52 = vcombine.low %v567_v45, %v583_v47  ;;  %v601_v53 = vcombine.high %v567_v45, %v583_v47  ;;  %s2260_s22 = smov [#allocation2]  }
 0x2ac   : > { %v592_v59 = vrot.slane %v584_v50, %v2450_v49  ;;  %v599_v60 = vrot.slane %v585_v51, %v2450_v49  ;;  %v608_v61 = vrot.slane %v600_v52, %v2450_v49  ;;  %v615_v62 = vrot.slane %v601_v53, %v2450_v49 }
 0x2ae   : > { %v620_v9 = vcombine.low %v592_v59, %v599_v60  ;;  %v1918_v10 = vcombine.high %v592_v59, %v599_v60  ;;  %v636_v11 = vcombine.low %v608_v61, %v615_v62  ;;  %v1919_v12 = vcombine.high %v608_v61, %v615_v62 }
 0x2b0   : > { %v627_v21 = vrot.slane %v620_v9, %v2439_v39  ;;  %v635_v23 = vrot.slane %v1918_v10, %v2439_v39  ;;  %v643_v24 = vrot.slane %v636_v11, %v2439_v39  ;;  %v651_v25 = vrot.slane %v1919_v12, %v2439_v39 }
 0x2b1   : > { %v441_v11 = vand.u32 127, %v438_v29  ;;  %v2258_v12 = vmov -1e+30  }
 0x2b2   : > { %v652_v40 = vcombine.low %v627_v21, %v635_v23  ;;  %v668_v41 = vcombine.low %v643_v24, %v651_v25  ;;  %v669_v43 = vcombine.high %v643_v24, %v651_v25 }
 0x2b3   : > { %vm442_vm3 = vcmp.ge.s32.totalorder %v2432_v32, %v441_v11 }
 0x2b4   : > { %v660_v51 = vrot.slane %v652_v40, %v2450_v49  ;;  %v676_v52 = vrot.slane %v668_v41, %v2450_v49 }
 0x2b6   : > { %v684_v60 = vcombine.low %v660_v51, %v676_v52 }
 0x314   : > { %v695_v42 = vpop.permute.xlu1 %694 }
 0x318   : > { %v697_v48 = vpop.permute.xlu1 %696 }
 0x319   : > { %v704_v54 = vcombine.low %v693_v34, %v697_v48  ;;  %v705_v55 = vcombine.high %v693_v34, %v697_v48 }
 0x31b   : > { %v712_v63 = vrot.slane %v704_v54, %v2439_v39  ;;  %v719_v1 = vrot.slane %v705_v55, %v2439_v39 }
 0x31c   : > { %v699_v56 = vpop.permute.xlu1 %698 }
 0x31d   : > { %v720_v57 = vcombine.low %v695_v42, %v699_v56  ;;  %v721_v58 = vcombine.high %v695_v42, %v699_v56  ;;  %v653_v42 = vcombine.high %v627_v21, %v635_v23  ;;  %v683_v56 = vrot.slane %v669_v43, %v2450_v49 }
 0x31f   : > { %v728_v2 = vrot.slane %v720_v57, %v2439_v39  ;;  %v735_v3 = vrot.slane %v721_v58, %v2439_v39  ;;  %v667_v55 = vrot.slane %v653_v42, %v2450_v49 }
 0x321   : > { %v736_v4 = vcombine.low %v712_v63, %v728_v2  ;;  %v737_v5 = vcombine.high %v712_v63, %v728_v2  ;;  %v752_v6 = vcombine.low %v719_v1, %v735_v3  ;;  %v753_v7 = vcombine.high %v719_v1, %v735_v3 }
 0x322   : > { %v687_v61 = vcombine.high %v667_v55, %v683_v56  ;;  %v688_v63 = vpack.c.bf16 %v684_v60, %v684_v60  ;;  %v686_v9 = vcombine.low %v667_v55, %v683_v56 }
 0x323   : > { %v744_v13 = vrot.slane %v736_v4, %v2450_v49  ;;  %v751_v14 = vrot.slane %v737_v5, %v2450_v49  ;;  %v760_v15 = vrot.slane %v752_v6, %v2450_v49  ;;  %v767_v16 = vrot.slane %v753_v7, %v2450_v49 }
 0x324   : > { %v691_v1 = vpack.c.bf16 %v687_v61, %v687_v61  ;;  %v685_v4 = vcombine.high %v660_v51, %v676_v52  ;;  %v690_v10 = vpack.c.bf16 %v686_v9, %v686_v9 }
 0x325   : > { %v772_v17 = vcombine.low %v744_v13, %v751_v14  ;;  %v1920_v18 = vcombine.high %v744_v13, %v751_v14  ;;  %v788_v19 = vcombine.low %v760_v15, %v767_v16  ;;  %v1921_v20 = vcombine.high %v760_v15, %v767_v16 }
 0x326   : > { %v689_v6 = vpack.c.bf16 %v685_v4, %v685_v4  ;;  %v443_v13 = vsel %vm442_vm3, 0.0, %v2258_v12 }
 0x327   : > { %v779_v30 = vrot.slane %v772_v17, %v2439_v39  ;;  %v787_v31 = vrot.slane %v1920_v18, %v2439_v39  ;;  %v795_v33 = vrot.slane %v788_v19, %v2439_v39  ;;  %v803_v34 = vrot.slane %v1921_v20, %v2439_v39 }
 0x329   : > { %v804_v35 = vcombine.low %v779_v30, %v787_v31  ;;  %v820_v36 = vcombine.low %v795_v33, %v803_v34  ;;  %v805_v37 = vcombine.high %v779_v30, %v787_v31  ;;  %v821_v38 = vcombine.high %v795_v33, %v803_v34 }
 0x32b   : > { %v812_v44 = vrot.slane %v804_v35, %v2450_v49  ;;  %v828_v45 = vrot.slane %v820_v36, %v2450_v49  ;;  %v819_v46 = vrot.slane %v805_v37, %v2450_v49  ;;  %v835_v47 = vrot.slane %v821_v38, %v2450_v49 }
 0x32d   : > { %v836_v48 = vcombine.low %v812_v44, %v828_v45  ;;  %v839_v50 = vcombine.high %v819_v46, %v835_v47  ;;  %v837_v59 = vcombine.high %v812_v44, %v828_v45  ;;  %v838_v3 = vcombine.low %v819_v46, %v835_v47 }
 0x32f   : > { %v840_v53 = vpack.c.bf16 %v836_v48, %v836_v48  ;;  %v843_v54 = vpack.c.bf16 %v839_v50, %v839_v50  ;;  %v841_v62 = vpack.c.bf16 %v837_v59, %v837_v59  ;;  %v842_v5 = vpack.c.bf16 %v838_v3, %v838_v3 }
 0x331   : > { %v1001_v57 = vsel %vm996_vm2, %v840_v53, 0  ;;  %v1139_v58 = vsel %vm996_vm2, %v843_v54, 0  ;;  %v1047_v2 = vsel %vm996_vm2, %v841_v62, 0  ;;  %v1093_v7 = vsel %vm996_vm2, %v842_v5, 0 }
 0x332   : > { %2004 = vmatpush3.bf16.xpose.msra.mxu1 %v1001_v57  ;;  %2022 = vmatpush3.bf16.xpose.msra.mxu0 %v1139_v58 }
 0x333   : > { %2009 = vmatprep.subr.bf16.mxu1 %v2250_v8  ;;  %2033 = vmatprep.subr.bf16.mxu0 %v2250_v8 }
 0x339   : > { %2006 = vmatmul.mubr.msk.bf16.vlgmr.msra.gmra.mrb[4].mxu1 %vm996_vm2, %v688_v63  ;;  %2024 = vmatmul.mubr.msk.bf16.vlgmr.msra.gmra.mrb[0].mxu0 %vm996_vm2, %v691_v1 }
 0x33a   : > { %2010 = vmatpush3.bf16.xpose.msra.mxu1 %v1047_v2  ;;  %2011 = vmatprep.mubr.msk.bf16.mxu1 %vm2251_vm1, %v2250_v8 }
 0x33b   : > { %2015 = vmatprep.subr.bf16.mxu1 %v2250_v8  ;;  %2035 = vmatprep.mubr.msk.bf16.mxu0 %vm2251_vm1, %v2250_v8 }
 0x341   : > { %2012 = vmatmul.mubr.msk.bf16.vlgmr.msra.gmra.mrb[8].mxu1 %vm996_vm2, %v689_v6 }
 0x342   : > { %2016 = vmatpush3.bf16.xpose.msra.mxu1 %v1093_v7  ;;  %2017 = vmatprep.mubr.msk.bf16.mxu1 %vm2251_vm1, %v2250_v8 }
 0x343   : > { %2027 = vmatprep.subr.bf16.mxu1 %v2250_v8 }
 0x349   : > { %2018 = vmatmul.mubr.msk.bf16.vlgmr.msra.gmra.mrb[12].mxu1 %vm996_vm2, %v690_v10 }
 0x34a   : > { %2029 = vmatprep.mubr.msk.bf16.mxu1 %vm2251_vm1, %v2250_v8 }
 0x40c   : > { %v1037_v14 = vpop.f32.mrb[4].mxu1  ;;  %v1175_v15 = vpop.f32.mrb[0].mxu0 }
 0x40d   : > { %v1038_v16 = vadd.f32 %v1037_v14, %v443_v13  ;;  %v2007_v17 = vpop.f32.mrb[5].mxu1  ;;  %v2025_v18 = vpop.f32.mrb[1].mxu0  ;;  %v1176_v33 = vadd.f32 %v1175_v15, %v443_v13 }
 0x40e   : > { %v1040_v19 = vpop.f32.mrb[6].mxu1  ;;  %v1178_v20 = vpop.f32.mrb[2].mxu0 }
 0x40f   : > { %v2008_v21 = vpop.f32.mrb[7].mxu1  ;;  %v2026_v23 = vpop.f32.mrb[3].mxu0  ;;  %v1181_v24 = vsel %vm996_vm2, %v1038_v16, -inf  ;;  %v1190_v35 = vsel %vm996_vm2, %v1176_v33, -inf }
 0x410   : > { %1182 = vmax.xlane.f32.xlu1 %v1181_v24 }
 0x414   : > { %v1083_v25 = vpop.f32.mrb[8].mxu1 }
 0x415   : > { %v1084_v30 = vadd.f32 %v1083_v25, %v443_v13  ;;  %v2013_v31 = vpop.f32.mrb[9].mxu1 }
 0x416   : > { %v1086_v29 = vpop.f32.mrb[10].mxu1 }
 0x417   : > { %v2014_v32 = vpop.f32.mrb[11].mxu1  ;;  %v1184_v34 = vsel %vm996_vm2, %v1084_v30, -inf }
 0x418   : > { %1185 = vmax.xlane.f32.xlu0 %v1184_v34 }
 0x41c   : > { %1191 = vmax.xlane.f32.xlu0 %v1190_v35  ;;  %v1129_v36 = vpop.f32.mrb[12].mxu1 }
 0x41d   : > { %v1130_v37 = vadd.f32 %v1129_v36, %v443_v13  ;;  %v2019_v38 = vpop.f32.mrb[13].mxu1 }
 0x41e   : > { %v1132_v40 = vpop.f32.mrb[14].mxu1 }
 0x41f   : > { %v2020_v41 = vpop.f32.mrb[15].mxu1  ;;  %v1187_v42 = vsel %vm996_vm2, %v1130_v37, -inf }
 0x420   : > { %1188 = vmax.xlane.f32.xlu1 %v1187_v42 }
 0x431   : > { %844 = vrot.lane.b32.xlu1 %v2416_v22, %s2259_s23 }
 0x49d   : > { %v1183_v43 = vpop.xlane.xlu1 %1182 }
 0x49e   : > { %v1193_v44 = vsub.f32 %v1038_v16, %v1183_v43 }
 0x4a0   : > { %v1197_v45 = vmul.f32 1.442695, %v1193_v44 }
 0x4a2   : > { %2166 = vpow2.f32 %v1197_v45 }
 0x4a5   : > { %v1186_v46 = vpop.xlane.xlu0 %1185 }
 0x4a6   : > { %v1194_v47 = vsub.f32 %v1084_v30, %v1186_v46 }
 0x4a8   : > { %v1199_v48 = vmul.f32 1.442695, %v1194_v47 }
 0x4a9   : > { %v1192_v22 = vpop.xlane.xlu0 %1191 }
 0x4aa   : > { %2168 = vpow2.f32 %v1199_v48  ;;  %v1196_v54 = vsub.f32 %v1176_v33, %v1192_v22 }
 0x4ac   : > { %v2507_v50 = vpop.eup %2166  ;;  %v1203_v56 = vmul.f32 1.442695, %v1196_v54 }
 0x4ad   : > { %v1205_v51 = vsel %vm996_vm2, %v2507_v50, 0.0  ;;  %v1189_v55 = vpop.xlane.xlu1 %1188 }
 0x4ae   : > { %1206 = vadd.xlane.f32.xlu1 %v1205_v51  ;;  %v1195_v57 = vsub.f32 %v1130_v37, %v1189_v55  ;;  %2170 = vpow2.f32 %v1203_v56 }
 0x4b0   : > { %v1201_v58 = vmul.f32 1.442695, %v1195_v57 }
 0x4b2   : > { %2172 = vpow2.f32 %v1201_v58 }
 0x4b4   : > { %v2511_v52 = vpop.eup %2168 }
 0x4b5   : > { %v1208_v53 = vsel %vm996_vm2, %v2511_v52, 0.0 }
 0x4b6   : > { %1209 = vadd.xlane.f32.xlu0 %v1208_v53 }
 0x4b8   : > { %v2518_v59 = vpop.eup %2170 }
 0x4b9   : > { %v1214_v60 = vsel %vm996_vm2, %v2518_v59, 0.0 }
 0x4bc   : > { %v2522_v61 = vpop.eup %2172 }
 0x4bf   : > { %848 = vrot.lane.b32.xlu1 %v2425_v27, %s2259_s23  ;;  %v1211_v27 = vsel %vm996_vm2, %v2522_v61, 0.0 }
 0x4c3   : > { %850 = vrot.lane.b32.xlu1 %v2428_v28, %s2259_s23 }
 0x4cc   : > { %846 = vrot.lane.b32.xlu0 %v2422_v26, %s2259_s23  ;;  %v845_v26 = vpop.permute.xlu1 %844  ;;  %s2190_s23 = sshll.u32 %s2260_s22, 4  ;;  %s2191_s23 = int_to_ptr.vmem [resolvable:$false] %s2190_s23 }
 0x4cd   : > { %s2192_s2 = scalar_lea.vmem %s2191_s23, 256  ;;  %p2193_p0 = scmp.lt.s32.totalorder %s2667_s15, %s2191_s23 }
 0x4ce   : > { %p2194_p1 = scmp.lt.s32.totalorder %s2192_s2, %s2186_s21 }
 0x4d0   : > { %p2195_p2 = por %p2194_p1, %p2193_p0 }
 0x4d2   : > { %p2196_p3 = pnand %p2195_p2, %p2189_p13 }
 0x4e7   : > { %1215 = vadd.xlane.f32.xlu1 %v1214_v60 }
 0x4eb   : > { %1212 = vadd.xlane.f32.xlu0 %v1211_v27 }
 0x53b   : > { %v1207_v28 = vpop.xlane.xlu1 %1206 }
 0x53c   : > { %2174 = vrcp.f32 %v1207_v28 }
 0x53f   : > { %v849_v62 = vpop.permute.xlu1 %848 }
 0x540   : > { %v856_v1 = vcombine.low %v845_v26, %v849_v62  ;;  %v857_v2 = vcombine.high %v845_v26, %v849_v62 }
 0x542   : > { %v864_v7 = vrot.slane %v856_v1, %v2439_v39  ;;  %v871_v9 = vrot.slane %v857_v2, %v2439_v39  ;;  %v1418_v1 = vld [vmem:[%s2713_s5] sm:$0xf] }
 0x543   : > { %v1210_v63 = vpop.xlane.xlu0 %1209  ;;  %v851_v3 = vpop.permute.xlu1 %850 }
 0x544   : > { %2176 = vrcp.f32 %v1210_v63 }
 0x546   : > { %v2175_v36 = vpop.eup %2174 }
 0x547   : > { %v847_v4 = vpop.permute.xlu0 %846 }
 0x548   : > { %v872_v5 = vcombine.low %v847_v4, %v851_v3  ;;  %v873_v6 = vcombine.high %v847_v4, %v851_v3  ;;  %v1420_v3 = vld [vmem:[%s2713_s5 + $0x8] sm:$0xf]  ;;  %v1421_v4 = vld [vmem:[%s2713_s5 + $0xc] sm:$0xf] }
 0x54a   : > { %v880_v10 = vrot.slane %v872_v5, %v2439_v39  ;;  %v887_v11 = vrot.slane %v873_v6, %v2439_v39 }
 0x54c   : > { %v888_v12 = vcombine.low %v864_v7, %v880_v10  ;;  %v889_v13 = vcombine.high %v864_v7, %v880_v10  ;;  %v904_v14 = vcombine.low %v871_v9, %v887_v11  ;;  %v905_v15 = vcombine.high %v871_v9, %v887_v11 }
 0x54e   : > { %v896_v16 = vrot.slane %v888_v12, %v2450_v49  ;;  %v903_v17 = vrot.slane %v889_v13, %v2450_v49  ;;  %v912_v18 = vrot.slane %v904_v14, %v2450_v49  ;;  %v919_v19 = vrot.slane %v905_v15, %v2450_v49  ;;  %v2177_v42 = vpop.eup %2176 }
 0x54f   : > { %v1222_v47 = vmul.f32 %v2177_v42, %v2511_v52  ;;  %v1518_v12 = vsel %vm1232_vm4, %v1420_v3, 0  ;;  %v1564_v13 = vsel %vm1232_vm4, %v1421_v4, 0  ;;  %v1938_v3 = vld [vmem:[%s2716_s8] ss:$0 sm:$0xff] }
 0x550   : > { %v924_v20 = vcombine.low %v896_v16, %v903_v17  ;;  %v1922_v21 = vcombine.high %v896_v16, %v903_v17  ;;  %v940_v23 = vcombine.low %v912_v18, %v919_v19  ;;  %v1923_v24 = vcombine.high %v912_v18, %v919_v19 }
 0x551   : > { %v1226_v56 = vpack.c.bf16 %v1222_v47, %v1222_v47 }
 0x552   : > { %v931_v25 = vrot.slane %v924_v20, %v2439_v39  ;;  %v939_v30 = vrot.slane %v1922_v21, %v2439_v39  ;;  %v947_v31 = vrot.slane %v940_v23, %v2439_v39  ;;  %v955_v29 = vrot.slane %v1923_v24, %v2439_v39 }
 0x553   : > { %v1221_v39 = vmul.f32 %v2175_v36, %v2507_v50 }
 0x554   : > { %v956_v33 = vcombine.low %v931_v25, %v939_v30  ;;  %v972_v32 = vcombine.low %v947_v31, %v955_v29  ;;  %v957_v34 = vcombine.high %v931_v25, %v939_v30  ;;  %v973_v35 = vcombine.high %v947_v31, %v955_v29 }
 0x556   : > { %v964_v37 = vrot.slane %v956_v33, %v2450_v49  ;;  %v980_v38 = vrot.slane %v972_v32, %v2450_v49  ;;  %v971_v40 = vrot.slane %v957_v34, %v2450_v49  ;;  %v987_v41 = vrot.slane %v973_v35, %v2450_v49 }
 0x557   : > { %v1225_v49 = vpack.c.bf16 %v1221_v39, %v1221_v39 }
 0x558   : > { %v988_v43 = vcombine.low %v964_v37, %v980_v38  ;;  %v989_v44 = vcombine.high %v964_v37, %v980_v38  ;;  %v990_v45 = vcombine.low %v971_v40, %v987_v41  ;;  %v991_v46 = vcombine.high %v971_v40, %v987_v41 }
 0x55a   : > { %v992_v48 = vpack.c.bf16 %v988_v43, %v988_v43  ;;  %v993_v51 = vpack.c.bf16 %v989_v44, %v989_v44  ;;  %v994_v54 = vpack.c.bf16 %v990_v45, %v990_v45  ;;  %v995_v55 = vpack.c.bf16 %v991_v46, %v991_v46 }
 0x55c   : > { %v1234_v53 = vsel %vm1232_vm4, %v992_v48, 0  ;;  %v1280_v22 = vsel %vm1232_vm4, %v993_v51, 0  ;;  %v1326_v50 = vsel %vm1232_vm4, %v994_v54, 0  ;;  %v1372_v52 = vsel %vm1232_vm4, %v995_v55, 0  ;;  %v1936_v48 = vld [vmem:[%s2714_s6] ss:$0 sm:$0xff] }
 0x55d   : > { %2028 = vmatpush3.bf16.msra.mxu1 %v1234_v53  ;;  %2034 = vmatpush3.bf16.msra.mxu0 %v1280_v22 }
 0x55e   : > { %2039 = vmatprep.subr.bf16.mxu1 %v2250_v8  ;;  %2045 = vmatprep.subr.bf16.mxu0 %v2250_v8 }
 0x560   : > { %2030 = vmatmul.mubr.msk.bf16.vlgmr.msra.gmra.mrb[16].mxu1 %vm996_vm2, %v1225_v49  ;;  %2036 = vmatmul.mubr.msk.bf16.vlgmr.msra.gmra.mrb[4].mxu0 %vm996_vm2, %v1226_v56 }
 0x561   : > { %2040 = vmatpush3.bf16.msra.mxu1 %v1326_v50  ;;  %2046 = vmatpush3.bf16.msra.mxu0 %v1372_v52 }
 0x562   : > { %2047 = vmatprep.mubr.msk.bf16.mxu0 %vm2251_vm1, %v2250_v8  ;;  %2041 = vmatprep.mubr.msk.bf16.mxu1 %vm2251_vm1, %v2250_v8 }
 0x563   : > { %2051 = vmatprep.subr.bf16.mxu1 %v2250_v8  ;;  %2057 = vmatprep.subr.bf16.mxu0 %v2250_v8 }
 0x574   : > { %v1216_v57 = vpop.xlane.xlu1 %1215 }
 0x575   : > { %2178 = vrcp.f32 %v1216_v57 }
 0x578   : > { %v1213_v58 = vpop.xlane.xlu0 %1212 }
 0x579   : > { %2180 = vrcp.f32 %v1213_v58 }
 0x57f   : > { %v2179_v60 = vpop.eup %2178 }
 0x580   : > { %v1224_v27 = vmul.f32 %v2179_v60, %v2518_v59  ;;  %v1419_v59 = vld [vmem:[%s2713_s5 + $0x4] sm:$0xf] }
 0x581   : > { %v1472_v2 = vsel %vm1232_vm4, %v1419_v59, 0  ;;  %v2154_v60 = vld [vmem:[%s2717_s9] sm:$0xff]  }
 0x582   : > { %v1228_v26 = vpack.c.bf16 %v1224_v27, %v1224_v27  ;;  %v2156_v27 = vld [vmem:[%s2719_s11] sm:$0xff]  }
 0x583   : > { %v2181_v28 = vpop.eup %2180 }
 0x584   : > { %v1223_v62 = vmul.f32 %v2181_v28, %v2522_v61  ;;  %2048 = vmatmul.mubr.msk.bf16.vlgmr.msra.gmra.mrb[8].mxu0 %vm996_vm2, %v1228_v26  ;;  %v1426_v61 = vsel %vm1232_vm4, %v1418_v1, 0  ;;  %v2157_v26 = vld [vmem:[%s2719_s11 + $0x8] sm:$0xff]   ;;  %v2158_v28 = vld [vmem:[%s2719_s11 + $0x10] sm:$0xff]  }
 0x585   : > { %2059 = vmatprep.mubr.msk.bf16.mxu0 %vm2251_vm1, %v2250_v8  ;;  %2058 = vmatpush3.bf16.msra.mxu0 %v1472_v2 }
 0x586   : > { %v1227_v63 = vpack.c.bf16 %v1223_v62, %v1223_v62  ;;  %2069 = vmatprep.subr.bf16.mxu0 %v2250_v8 }
 0x588   : > { %2042 = vmatmul.mubr.msk.bf16.vlgmr.msra.gmra.mrb[20].mxu1 %vm996_vm2, %v1227_v63 }
 0x589   : > { %2053 = vmatprep.mubr.msk.bf16.mxu1 %vm2251_vm1, %v2250_v8  ;;  %2052 = vmatpush3.bf16.msra.mxu1 %v1426_v61  ;;  %v1937_v61 = vld [vmem:[%s2715_s7] ss:$0 sm:$0xff] }
 0x58a   : > { %2063 = vmatprep.subr.bf16.mxu1 %v2250_v8 }
 0x633   : > { %v1270_v5 = vpop.f32.mrb[16].mxu1  ;;  %v1316_v6 = vpop.f32.mrb[4].mxu0 }
 0x634   : > { %v1414_v7 = vpack.c.bf16 %v1270_v5, %v1270_v5  ;;  %v1415_v9 = vpack.c.bf16 %v1316_v6, %v1316_v6  ;;  %v2031_v10 = vpop.f32.mrb[17].mxu1  ;;  %v2037_v11 = vpop.f32.mrb[5].mxu0 }
 0x635   : > { %v1273_v14 = vpop.f32.mrb[18].mxu1  ;;  %v1319_v15 = vpop.f32.mrb[6].mxu0  ;;  %v2161_v10 = vld [vmem:[%s2719_s11 + $0x28] sm:$0xff]   ;;  %v2162_v11 = vld [vmem:[%s2719_s11 + $0x30] sm:$0xff]  }
 0x636   : > { %v2032_v16 = vpop.f32.mrb[19].mxu1  ;;  %v2038_v17 = vpop.f32.mrb[7].mxu0  ;;  %2054 = vmatmul.mubr.msk.bf16.vlgmr.msra.gmra.mrb[24].mxu1 %vm996_vm2, %v1414_v7  ;;  %2060 = vmatmul.mubr.msk.bf16.vlgmr.msra.gmra.mrb[12].mxu0 %vm996_vm2, %v1415_v9  ;;  %v2159_v7 = vld [vmem:[%s2719_s11 + $0x18] sm:$0xff]   ;;  %v2160_v9 = vld [vmem:[%s2719_s11 + $0x20] sm:$0xff]  }
 0x637   : > { %2064 = vmatpush3.bf16.msra.mxu1 %v1518_v12  ;;  %2070 = vmatpush3.bf16.msra.mxu0 %v1564_v13  ;;  %v2163_v12 = vld [vmem:[%s2719_s11 + $0x38] sm:$0xff]   ;;  %v1939_v13 = vld [vmem:[%s2718_s10] ss:$0 sm:$0xff] }
 0x638   : > { %2071 = vmatprep.mubr.msk.bf16.mxu0 %vm2251_vm1, %v2250_v8  ;;  %2065 = vmatprep.mubr.msk.bf16.mxu1 %vm2251_vm1, %v2250_v8 }
 0x639   : > { %2075 = vmatprep.subr.bf16.mxu1 %v2250_v8  ;;  %2083 = vmatprep.subr.bf16.mxu0 %v2250_v8 }
 0x657   : > { %v1408_v18 = vpop.f32.mrb[8].mxu0 }
 0x658   : > { %v1417_v19 = vpack.c.bf16 %v1408_v18, %v1408_v18  ;;  %v2049_v20 = vpop.f32.mrb[9].mxu0 }
 0x659   : > { %v1411_v21 = vpop.f32.mrb[10].mxu0 }
 0x65a   : > { %v2050_v23 = vpop.f32.mrb[11].mxu0  ;;  %2072 = vmatmul.mubr.msk.bf16.vlgmr.msra.gmra.mrb[16].mxu0 %vm996_vm2, %v1417_v19 }
 0x65b   : > { %v1362_v24 = vpop.f32.mrb[20].mxu1  ;;  %2099 = vmatprep.mubr.msk.bf16.mxu0 %vm2251_vm1, %v2250_v8  ;;  %2084 = vmatpush3.bf16.msra.mxu0 %v2156_v27 }
 0x65c   : > { %v1416_v25 = vpack.c.bf16 %v1362_v24, %v1362_v24  ;;  %v2043_v30 = vpop.f32.mrb[21].mxu1  ;;  %2085 = vmatprep.subr.bf16.mxu0 %v2250_v8 }
 0x65d   : > { %v1365_v31 = vpop.f32.mrb[22].mxu1 }
 0x65e   : > { %v2044_v29 = vpop.f32.mrb[23].mxu1  ;;  %2066 = vmatmul.mubr.msk.bf16.vlgmr.msra.gmra.mrb[28].mxu1 %vm996_vm2, %v1416_v25  ;;  %v1943_v25 = vld [vmem:[%s2720_s12] ss:$0 sm:$0xff] }
 0x65f   : > { %2079 = vmatprep.mubr.msk.bf16.mxu1 %vm2251_vm1, %v2250_v8  ;;  %2076 = vmatpush3.bf16.msra.mxu1 %v2154_v60 }
 0x660   : > { %2077 = vmatprep.subr.bf16.mxu1 %v2250_v8  ;;  %2086 = vmatpush3.bf16.msra.mxu0 %v2157_v26 }
 0x661   : > { %2087 = vmatprep.subr.bf16.mxu0 %v2250_v8 }
 0x664   : > { %2088 = vmatpush3.bf16.msra.mxu0 %v2158_v28 }
 0x665   : > { %2089 = vmatprep.subr.bf16.mxu0 %v2250_v8 }
 0x668   : > { %2090 = vmatpush3.bf16.msra.mxu0 %v2159_v7 }
 0x669   : > { %2091 = vmatprep.subr.bf16.mxu0 %v2250_v8 }
 0x66c   : > { %2092 = vmatpush3.bf16.msra.mxu0 %v2160_v9 }
 0x66d   : > { %2093 = vmatprep.subr.bf16.mxu0 %v2250_v8 }
 0x670   : > { %2094 = vmatpush3.bf16.msra.mxu0 %v2161_v10 }
 0x671   : > { %2095 = vmatprep.subr.bf16.mxu0 %v2250_v8 }
 0x674   : > { %2096 = vmatpush3.bf16.msra.mxu0 %v2162_v11 }
 0x675   : > { %2097 = vmatprep.subr.bf16.mxu0 %v2250_v8 }
 0x678   : > { %2098 = vmatpush3.bf16.msra.mxu0 %v2163_v12 }
 0x709   : > { %v1462_v33 = vpop.f32.mrb[24].mxu1  ;;  %v1508_v32 = vpop.f32.mrb[12].mxu0 }
 0x70a   : > { %v1606_v34 = vadd.f32 %v1508_v32, %v1462_v33  ;;  %v2055_v35 = vpop.f32.mrb[25].mxu1  ;;  %v2061_v36 = vpop.f32.mrb[13].mxu0 }
 0x70b   : > { %v1465_v37 = vpop.f32.mrb[26].mxu1  ;;  %v1511_v38 = vpop.f32.mrb[14].mxu0 }
 0x70c   : > { %v2056_v40 = vpop.f32.mrb[27].mxu1  ;;  %v2062_v41 = vpop.f32.mrb[15].mxu0 }
 0x72d   : > { %v1600_v42 = vpop.f32.mrb[16].mxu0 }
 0x72e   : > { %v2073_v43 = vpop.f32.mrb[17].mxu0 }
 0x72f   : > { %v1603_v44 = vpop.f32.mrb[18].mxu0 }
 0x730   : > { %v2074_v45 = vpop.f32.mrb[19].mxu0 }
 0x731   : > { %v1554_v46 = vpop.f32.mrb[28].mxu1 }
 0x732   : > { %v1607_v39 = vadd.f32 %v1606_v34, %v1554_v46  ;;  %v2067_v47 = vpop.f32.mrb[29].mxu1 }
 0x733   : > { %v1557_v51 = vpop.f32.mrb[30].mxu1 }
 0x734   : > { %v1608_v53 = vadd.f32 %v1607_v39, %v1600_v42  ;;  %v2068_v22 = vpop.f32.mrb[31].mxu1 }
 0x736   : > { %v1616_v54 = vadd.f32 %v1936_v48, %v1608_v53 }
 0x738   : > { %v2602_v55 = vadd.f32 %v1616_v54, %v2384_v0  ;;  %v2155_v0 = vld [vmem:[%s2717_s9 + $0x8] sm:$0xff]  }
 0x739   : > { %2078 = vmatpush3.bf16.msra.mxu1 %v2155_v0 }
 0x73a   : > { %v1620_v49 = vsel %vm446_vm0, %v2602_v55, 0.0 }
 0x73b   : > { %1621 = vadd.xlane.f32.xlu0 %v1620_v49 }
 0x7c8   : > { %v1622_v56 = vpop.xlane.xlu0 %1621 }
 0x7c9   : > { %v1623_v50 = vmul.f32 0.03125, %v1622_v56 }
 0x7cb   : > { %v1624_v52 = vsub.f32 %v2602_v55, %v1623_v50 }
 0x7cd   : > { %v1625_v57 = vmul.f32 %v1624_v52, %v1624_v52 }
 0x7cf   : > { %v1626_v58 = vsel %vm446_vm0, %v1625_v57, 0.0 }
 0x7d0   : > { %1627 = vadd.xlane.f32.xlu0 %v1626_v58 }
 0x85d   : > { %v1628_v62 = vpop.xlane.xlu0 %1627 }
 0x85e   : > { %v1629_v63 = vmul.f32 0.03125, %v1628_v62 }
 0x860   : > { %v1630_v1 = vadd.f32 1e-05, %v1629_v63 }
 0x862   : > { %2182 = vrsqrt.f32 %v1630_v1 }
 0x86c   : > { %v2183_v59 = vpop.eup %2182 }
 0x86d   : > { %v1632_v2 = vmul.f32 %v2183_v59, %v1624_v52 }
 0x86f   : > { %v1639_v4 = vmul.f32 %v1937_v61, %v1632_v2 }
 0x871   : > { %v1646_v5 = vadd.f32 %v1938_v3, %v1639_v4 }
 0x873   : > { %v1647_v6 = vpack.c.bf16 %v1646_v5, %v1646_v5 }
 0x875   : > { %2080 = vmatmul.mubr.msk.bf16.vlgmr.msra.gmra.mrb[32].mxu1 %vm446_vm0, %v1647_v6 }
 0x948   : > { %v1708_v14 = vpop.f32.mrb[32].mxu1 }
 0x949   : > { %v1709_v15 = vadd.f32 %v1939_v13, %v1708_v14  ;;  %v2081_v16 = vpop.f32.mrb[33].mxu1 }
 0x94a   : > { %v1711_v17 = vpop.f32.mrb[34].mxu1 }
 0x94b   : > { %v1715_v18 = vmul.f32 0.70710677, %v1709_v15  ;;  %v2082_v19 = vpop.f32.mrb[35].mxu1  ;;  %v1714_v8 = vmul.f32 0.5, %v1709_v15 }
 0x94d   : > { %2184 = verf.f32 %v1715_v18 }
 0x957   : > { %v2185_v20 = vpop.eup %2184 }
 0x958   : > { %v1717_v21 = vadd.f32 1.0, %v2185_v20 }
 0x95a   : > { %v1718_v23 = vmul.f32 %v1717_v21, %v1714_v8 }
 0x95c   : > { %v1719_v24 = vpack.c.bf16 %v1718_v23, %v1718_v23 }
 0x95e   : > { %2100 = vmatmul.mubr.bf16.vlgmr.msra.gmra.mrb[20].mxu0 %v1719_v24 }
 0xa31   : > { %v1825_v30 = vpop.f32.mrb[20].mxu0 }
 0xa32   : > { %v1826_v31 = vadd.f32 %v1943_v25, %v1825_v30  ;;  %v2101_v29 = vpop.f32.mrb[21].mxu0 }
 0xa33   : > { %v1828_v33 = vpop.f32.mrb[22].mxu0 }
 0xa34   : > { %v1831_v32 = vadd.f32 %v1826_v31, %v2602_v55  ;;  %v2102_v34 = vpop.f32.mrb[23].mxu0 }
 0xa36   : > { %1832 = vst.msk [vmem:[%s431_s30] sm:$0xff] %vm446_vm0, %v1831_v32 }
 0xa37   : > { %2199 = shalt.err (!%p2196_p3)
}
 0xa38   : > { %s2200_s0 = scalar_lea.hbm %s2665_s1, 128  ;;  %s2204_s30 = scalar_lea.hbm %s2721_s13, 256 }
 0xa39   : > { %p2201_p4 = scmp.ne.s32.totalorder %s2665_s1, %s2200_s0  ;;  %p2205_p9 = scmp.lt.u32.totalorder %s2665_s1, %s2721_s13 }
 0xa3a   : > { %p2206_p10 = scmp.lt.u32.totalorder %s2204_s30, %s2200_s0  ;;  %p2208_p12 = scmp.lt.u32.totalorder %s2200_s0, %s2665_s1 }
 0xa3b   : > { %p2202_p7 = pnand %p2201_p4, %p2369_p5 }
 0xa3c   : > { %p2207_p11 = por %p2206_p10, %p2205_p9 }
 0xa3d   : > { %p2203_p8 = pneg %p2202_p7 }
 0xa3e   : > { %p2209_p13 = por %p2208_p12, %p2207_p11 }
 0xa40   : > { %p2210_p0 = pnand %p2209_p13, %p2203_p8 }
 0xa42   : > { %2213 = shalt.err (!%p2210_p0)
}
 0xa43   : > { %2103 = dma.vmem_to_hbm [thread:$0]  (%p2369_p5), %s2667_s15, 128, %s2665_s1, %s1834_s29  }
 0xa44 PF: > { %p2109_p1 = scmp.ge.s32.totalorder %s2248_s28, 2  ;;  %s1859_s2 = sand.u32 1, %s2236_s25  }
 0xa45   : > { %s1860_s21 = scalar_lea.sflag [#allocation3], %s1859_s2 }
 0xa46   : > { %p2106_p2 = pnand %p2109_p1, %p2373_p6 }
 0xa48   : > { %2231 = dma.done.wait (!%p2106_p2), %s1860_s21, 128  }
 0xa49   : > { %2233 = vsyncadd (!%p2106_p2), %s1860_s21, 4294967168  ;;  %p23_p3 = scmp.ge.s32.totalorder %s2356_s14, 4   ;;  %s2730_s25 = smov %s2240_s26 }
 0xa4a   : > { %s2731_s26 = smov %s2244_s27  ;;  %s2732_s27 = smov %s2367_s17 }
 0xa4b   : > { %s2733_s28 = smov %s2356_s14  ;;  %25 = sbr.rel (!%p23_p3) target bundleno = 7 (0x7), region = 107 }
 0xa52   :  { %1865 = vsyncpa [#allocation3], 1 }
 0xa53   :  { %1867 = vsyncpa [#allocation3 + $0x1], 1 }

</bundles_post_ra>
